<compile_context>
chip_gen: v5e
topology: v5e:2x2
jax: 0.10.0
libtpu: 0.0.40
codegen_flags: <defaults>
</compile_context>

<pallas_src>
import functools
import math

import jax
import jax.numpy as jnp
from jax.experimental import pallas as pl
from jax.experimental.pallas import tpu as pltpu


def _round_up(x, m):
    return ((x + m - 1) // m) * m


def lpe_kernel(pos_ref, freq_ref, mask_ref, out_ref, *, max_pos):
    # pos_ref:  (TILE_M, 1)   int32   -- flattened position ids for this row tile
    # freq_ref: (1, D_pad)    float32 -- base*div_term + beta, expanded per column
    # mask_ref: (1, D_pad)    float32 -- 1.0 on odd columns within each chunk, else 0.0
    # out_ref:  (TILE_M, D_pad) out_dtype
    pos = jnp.clip(pos_ref[...], 0, max_pos).astype(jnp.float32)      # (TILE_M, 1)
    # cos overwrites sin in the reference; even columns stay zero -> cos * mask.
    enc = jnp.cos(pos * freq_ref[...]) * mask_ref[...]                # (TILE_M, D_pad) f32
    out_ref[...] = enc.astype(out_ref.dtype)                          # lane-dense store


def learnable_positional_encoding(position_ids, num_embeddings, embedding_dim,
                                  chunks=1, base=1.0, alpha=0.0, beta=0.0,
                                  out_dtype=jnp.float32):
    assert embedding_dim % 2 == 0
    half_dim = embedding_dim // (2 * chunks)
    assert half_dim > 1, "half_dim == 1 gives div-by-zero in div_term (as in the module)"

    B, L = position_ids.shape
    D = embedding_dim
    chunk_dim = D // chunks
    M = B * L

    # ---- parameter / buffer setup (glue, matches __init__) ----
    # alpha only feeds the dead sin branch, so it never reaches the output.
    div_term = jnp.exp(
        jnp.arange(half_dim, dtype=jnp.float32) * -(math.log(10000.0) / (half_dim - 1))
    )
    col = jnp.arange(D)
    within = col % chunk_dim
    odd_mask = (within % 2 == 1).astype(jnp.float32)          # (D,)
    freq_cos = (base * div_term[within // 2] + beta).astype(jnp.float32)  # (D,)

    # ---- lane-dense padding on D ----
    D_pad = _round_up(D, 128)
    pad_d = D_pad - D
    freq_p = jnp.pad(freq_cos, (0, pad_d)).reshape(1, D_pad)
    mask_p = jnp.pad(odd_mask, (0, pad_d)).reshape(1, D_pad)   # padded cols masked to 0

    # ---- row tile sizing ----
    # Budget the double-buffered pipeline footprint: 2x output block plus 2x the
    # lane-padded (tile_m, 1) pos block (1 useful column padded to 128 lanes in
    # VMEM).  ~16 MiB budget -> 4-8 MiB output blocks across typical D, well
    # inside the explicit 32 MiB vmem limit below (v7x-safe: 64 MiB physical).
    out_bytes = jnp.dtype(out_dtype).itemsize
    bytes_per_row = 2 * D_pad * out_bytes + 2 * 128 * 4
    vmem_budget = 16 << 20
    tile_m = max(16, (vmem_budget // bytes_per_row) // 16 * 16)  # x16: bf16-tile friendly
    if M <= tile_m:
        tile_m = _round_up(M, 16)
    M_pad = _round_up(M, tile_m)

    pos_flat = position_ids.astype(jnp.int32).reshape(M)
    pos_flat = jnp.pad(pos_flat, (0, M_pad - M))               # padded rows -> id 0 (in-range)
    pos2d = pos_flat.reshape(M_pad, 1)

    grid = (M_pad // tile_m,)
    kernel = functools.partial(lpe_kernel, max_pos=num_embeddings - 1)

    out = pl.pallas_call(
        kernel,
        out_shape=jax.ShapeDtypeStruct((M_pad, D_pad), out_dtype),
        grid_spec=pltpu.PrefetchScalarGridSpec(
            num_scalar_prefetch=0,
            grid=grid,
            in_specs=[
                pl.BlockSpec((tile_m, 1), lambda i: (i, 0)),
                pl.BlockSpec((1, D_pad), lambda i: (0, 0)),   # constant resident
                pl.BlockSpec((1, D_pad), lambda i: (0, 0)),   # constant resident
            ],
            out_specs=pl.BlockSpec((tile_m, D_pad), lambda i: (i, 0)),
        ),
        compiler_params=pltpu.CompilerParams(
            dimension_semantics=("parallel",),          # megacore-shards the row grid
            vmem_limit_bytes=32 * 1024 * 1024,          # admit the larger blocks everywhere
        ),
    )(pos2d, freq_p, mask_p)

    return out[:M, :D].reshape(B, L, D)


def reference(position_ids, num_embeddings, embedding_dim, chunks, base, alpha, beta):
    """Plain-JAX port of the PyTorch forward (incl. the duplicated slice write)."""
    D = embedding_dim
    half_dim = D // (2 * chunks)
    chunk_dim = D // chunks
    positions = jnp.arange(num_embeddings, dtype=jnp.float32)
    div_term = jnp.exp(
        jnp.arange(half_dim, dtype=jnp.float32) * -(math.log(10000.0) / (half_dim - 1))
    )
    dts = jnp.sin(positions[:, None] * (base * div_term + alpha)[None])
    dtc = jnp.cos(positions[:, None] * (base * div_term + beta)[None])
    weights = jnp.zeros((num_embeddings, D), jnp.float32)
    for ci in range(chunks):
        sl = slice(chunk_dim * ci + 1, chunk_dim * (ci + 1), 2)
        weights = weights.at[:, sl].set(dts)
        weights = weights.at[:, sl].set(dtc)  # overwrites sin, as in the module
    enc = weights[position_ids.reshape(-1)]
    return enc.reshape(position_ids.shape[0], position_ids.shape[1], D)


if __name__ == "__main__":
    key = jax.random.PRNGKey(0)
    B, L = 2, 8
    num_embeddings, embedding_dim, chunks = 16, 32, 2
    # Parameters exactly as in __init__: base=1, alpha=0, beta=0.
    base, alpha, beta = 1.0, 0.0, 0.0

    position_ids = jax.random.randint(key, (B, L), 0, num_embeddings, dtype=jnp.int32)
    ref = reference(position_ids, num_embeddings, embedding_dim, chunks, base, alpha, beta)

    # float32 path (bit-compatible with the PyTorch buffer build).
    out = learnable_positional_encoding(
        position_ids, num_embeddings, embedding_dim, chunks, base, alpha, beta,
        out_dtype=jnp.float32)
    jax.block_until_ready(out)
    assert out.shape == (B, L, embedding_dim)
    assert jnp.allclose(out, ref, atol=1e-5, rtol=1e-5), "f32 mismatch vs reference"

    # bfloat16 path (store-bandwidth lever on v5e); cast happens in-kernel.
    out_bf16 = learnable_positional_encoding(
        position_ids, num_embeddings, embedding_dim, chunks, base, alpha, beta,
        out_dtype=jnp.bfloat16)
    jax.block_until_ready(out_bf16)
    assert out_bf16.dtype == jnp.bfloat16
    assert jnp.allclose(out_bf16.astype(jnp.float32), ref, atol=2e-2, rtol=2e-2), \
        "bf16 mismatch vs reference"

    print("KERNEL_OK")
</pallas_src>

<mosaic_0001>
module attributes {stable_mosaic.version = 11 : i64} {
  func.func @lpe_kernel(%arg0: i32, %arg1: memref<16x1xi32, #tpu.memory_space<vmem>>, %arg2: memref<1x128xf32, #tpu.memory_space<vmem>>, %arg3: memref<1x128xf32, #tpu.memory_space<vmem>>, %arg4: memref<16x128xf32, #tpu.memory_space<vmem>>) attributes {dimension_semantics = [#tpu.dimension_semantics<parallel>], iteration_bounds = array<i64: 1>, scalar_prefetch = 0 : i64, scratch_operands = 0 : i64, tpu.core_type = #tpu.core_type<tc>, window_params = [{transform_indices = @transform_0, window_bounds = array<i64: 16, 1>}, {pipeline_mode = #tpu.pipeline_mode<synchronous>, transform_indices = @transform_1, window_bounds = array<i64: 1, 128>}, {pipeline_mode = #tpu.pipeline_mode<synchronous>, transform_indices = @transform_2, window_bounds = array<i64: 1, 128>}, {transform_indices = @transform_3, window_bounds = array<i64: 16, 128>}]} {
    %c0 = arith.constant 0 : index
    %c0_0 = arith.constant 0 : index
    %0 = vector.load %arg1[%c0, %c0_0] : memref<16x1xi32, #tpu.memory_space<vmem>>, vector<16x1xi32>
    %c0_i32 = arith.constant 0 : i32
    %c15_i32 = arith.constant 15 : i32
    %1 = vector.broadcast %c0_i32 : i32 to vector<16x1xi32>
    %2 = arith.maxsi %1, %0 : vector<16x1xi32>
    %3 = vector.broadcast %c15_i32 : i32 to vector<16x1xi32>
    %4 = arith.minsi %3, %2 : vector<16x1xi32>
    %5 = arith.sitofp %4 : vector<16x1xi32> to vector<16x1xf32>
    %c0_1 = arith.constant 0 : index
    %c0_2 = arith.constant 0 : index
    %6 = vector.load %arg2[%c0_1, %c0_2] : memref<1x128xf32, #tpu.memory_space<vmem>>, vector<1x128xf32>
    %7 = vector.broadcast %5 : vector<16x1xf32> to vector<16x128xf32>
    %8 = vector.broadcast %6 : vector<1x128xf32> to vector<16x128xf32>
    %9 = arith.mulf %7, %8 : vector<16x128xf32>
    %10 = math.cos %9 : vector<16x128xf32>
    %c0_3 = arith.constant 0 : index
    %c0_4 = arith.constant 0 : index
    %11 = vector.load %arg3[%c0_3, %c0_4] : memref<1x128xf32, #tpu.memory_space<vmem>>, vector<1x128xf32>
    %12 = vector.broadcast %11 : vector<1x128xf32> to vector<16x128xf32>
    %13 = arith.mulf %10, %12 : vector<16x128xf32>
    %c0_5 = arith.constant 0 : index
    %c0_6 = arith.constant 0 : index
    %14 = vector.load %arg4[%c0_5, %c0_6] : memref<16x128xf32, #tpu.memory_space<vmem>>, vector<16x128xf32>
    tpu.vector_store %arg4[%c0_5, %c0_6], %13 {strides = array<i32>} : memref<16x128xf32, #tpu.memory_space<vmem>>, vector<16x128xf32>,
    return
  }
  func.func @transform_0(%arg0: i32) -> (i32, i32) {
    %c0_i32 = arith.constant 0 : i32
    %c0_i32_0 = arith.constant 0 : i32
    return %arg0, %c0_i32 : i32, i32
  }
  func.func @transform_1(%arg0: i32) -> (i32, i32) {
    %c0_i32 = arith.constant 0 : i32
    %c0_i32_0 = arith.constant 0 : i32
    %c0_i32_1 = arith.constant 0 : i32
    return %c0_i32, %c0_i32_0 : i32, i32
  }
  func.func @transform_2(%arg0: i32) -> (i32, i32) {
    %c0_i32 = arith.constant 0 : i32
    %c0_i32_0 = arith.constant 0 : i32
    %c0_i32_1 = arith.constant 0 : i32
    return %c0_i32, %c0_i32_0 : i32, i32
  }
  func.func @transform_3(%arg0: i32) -> (i32, i32) {
    %c0_i32 = arith.constant 0 : i32
    %c0_i32_0 = arith.constant 0 : i32
    return %arg0, %c0_i32 : i32, i32
  }
}

</mosaic_0001>

<bundles_post_ra>
// kernel: tpu_custom_call.1
= control target key start
LH: loop header
LB: loop body
LE: loop exit
PB: predicated region body
PF: predicated region fallthrough
CT: control target
= control target key end

     0   :  { %v422_v2 = vmov 0   ;;  %s621_s0 = inlined_call_operand.vmem [shape: s32[16,1], index: 0, kind: input, shape index: {}]   ;;  %s622_s1 = inlined_call_operand.vmem [shape: f32[1,128], index: 1, kind: input, shape index: {}]   ;;  %s623_s2 = inlined_call_operand.vmem [shape: f32[1,128], index: 2, kind: input, shape index: {}]   ;;  %s624_s3 = inlined_call_operand.hbm [shape: f32[16,128], index: 3, kind: output, shape index: {}]  }
   0x1   :  { %v15_v0 = vld [vmem:[%s621_s0] sm:$0xff]  ;;  %v16_v1 = vld [vmem:[%s621_s0 + $0x8] sm:$0xff]  ;;  %393 = vset.pattern.permute.xlu0 %v422_v2 }
   0x2   :  { %vm17_vm0 = vcmp.gt.s32.totalorder %v15_v0, 0  ;;  %vm19_vm1 = vcmp.gt.s32.totalorder %v16_v1, 0 }
   0x3   :  { %v18_v3 = vsel %vm17_vm0, %v15_v0, 0  ;;  %v20_v4 = vsel %vm19_vm1, %v16_v1, 0 }
   0x4   :  { %vm21_vm2 = vcmp.lt.s32.totalorder %v18_v3, 15 }
   0x5   :  { %v22_v5 = vsel %vm21_vm2, %v18_v3, 15 }
   0x6   :  { %8 = vsyncpa [#allocation3], 0  ;;  %v25_v6 = vcvt.s32.f32 %v22_v5  ;;  %vm23_vm3 = vcmp.lt.s32.totalorder %v20_v4, 15  ;;  %v394_v9 = vld [vmem:[%s622_s1] ss:$0 sm:$0xff]  ;;  %s365_s21 = sshll.u32 %s624_s3, 4  ;;  %s366_s21 = int_to_ptr.hbm [resolvable:$true] %s365_s21 }
   0x7   :  { %v24_v7 = vsel %vm23_vm3, %v20_v4, 15  ;;  %v423_v31 = vmov 683565275   ;;  %v424_v33 = vmov 2475754826   ;;  %s430_s22 = smov 128  }
   0x8   :  { %30 = vperm.xlu0 %393, %v25_v6   ;;  %v26_v8 = vcvt.s32.f32 %v24_v7  ;;  %v425_v37 = vmov 2131351028   ;;  %v426_v40 = vmov 2102212464   ;;  %v427_v43 = vmov 920167782  }
   0x9   :  { %v428_v46 = vmov 1326507024   ;;  %s431_s23 = smov 8  }
  0x10   :  { %35 = vperm.xlu0 %393, %v26_v8  }
  0x7a   :  { %v31_v10 = vpop.permute.xlu0 %30 }
  0x7b   :  { %v462_v11 = vmul.f32 %v394_v9, %v31_v10 }
  0x7d   :  { %v43_v12 = vand.u32 2147483647, %v462_v11  ;;  %v46_v13 = vand.u32 2139095040, %v462_v11 }
  0x7f   :  { %v47_v14 = vshrl.u32 %v46_v13, 23  ;;  %v50_v15 = vand.u32 8388607, %v43_v12 }
  0x81   :  { %v377_v16 = vadd.s32 4294967169, %v47_v14  ;;  %v51_v17 = vor.u32 8388608, %v50_v15 }
  0x82   :  { %v36_v18 = vpop.permute.xlu0 %35 }
  0x83   :  { %v53_v19 = vadd.s32 1, %v377_v16  ;;  %v468_v20 = vmul.f32 %v394_v9, %v36_v18  ;;  %v470_v21 = vshll.u32 %v51_v17, 8 }
  0x85   :  { %vm54_vm4 = vcmp.gt.s32.totalorder %v53_v19, 0  ;;  %v197_v23 = vand.u32 2147483647, %v468_v20  ;;  %v200_v24 = vand.u32 2139095040, %v468_v20  ;;  %v92_v27 = vand.u32 65535, %v470_v21 }
  0x86   :  { %v55_v22 = vsel %vm54_vm4, %v53_v19, 0  ;;  %v93_v28 = vshrl.u32 %v470_v21, 16 }
  0x87   :  { %v57_v25 = vand.u32 31, %v55_v22  ;;  %v201_v29 = vshrl.u32 %v200_v24, 23  ;;  %v56_v30 = vshrl.u32 %v55_v22, 5  ;;  %v480_v35 = vand.u32 8388607, %v197_v23 }
  0x89   :  { %v58_v26 = vsub.s32 32, %v57_v25  ;;  %v60_v32 = vshll.u32 %v423_v31, %v57_v25  ;;  %v63_v34 = vshll.u32 %v424_v33, %v57_v25  ;;  %v66_v39 = vshll.u32 %v425_v37, %v57_v25 }
  0x8a   :  { %v69_v42 = vshll.u32 %v426_v40, %v57_v25  ;;  %v72_v45 = vshll.u32 %v427_v43, %v57_v25  ;;  %v380_v51 = vadd.s32 4294967169, %v201_v29  ;;  %vm75_vm5 = vcmp.lt.s32.totalorder %v56_v30, 1 }
  0x8b   :  { %v61_v36 = vshrl.u32 %v424_v33, %v58_v26  ;;  %v64_v38 = vshrl.u32 %v425_v37, %v58_v26  ;;  %v67_v41 = vshrl.u32 %v426_v40, %v58_v26  ;;  %v70_v44 = vshrl.u32 %v427_v43, %v58_v26 }
  0x8c   :  { %v73_v47 = vshrl.u32 %v428_v46, %v58_v26  ;;  %vm78_vm6 = vcmp.lt.s32.totalorder %v56_v30, 4  ;;  %v59_v54 = vshrl.u32 %v423_v31, %v58_v26  ;;  %vm77_vm7 = vcmp.lt.s32.totalorder %v56_v30, 3 }
  0x8d   :  { %v62_v48 = vor.u32 %v61_v36, %v60_v32  ;;  %v65_v49 = vor.u32 %v64_v38, %v63_v34  ;;  %v68_v50 = vor.u32 %v67_v41, %v66_v39  ;;  %v71_v52 = vor.u32 %v70_v44, %v69_v42 }
  0x8e   :  { %v74_v53 = vor.u32 %v73_v47, %v72_v45  ;;  %v207_v60 = vadd.s32 1, %v380_v51  ;;  %vm76_vm8 = vcmp.lt.s32.totalorder %v56_v30, 2  ;;  %v205_v8 = vor.u32 8388608, %v480_v35 }
  0x8f   :  { %v80_v55 = vsel %vm78_vm6, %v68_v50, 2102212464  ;;  %v83_v56 = vsel %vm75_vm5, %v62_v48, %v65_v49  ;;  %v87_v57 = vsel %vm75_vm5, %v65_v49, %v68_v50  ;;  %v84_v58 = vsel %vm78_vm6, %v71_v52, 920167782 }
  0x90   :  { %v88_v59 = vsel %vm78_vm6, %v74_v53, 1326507024  ;;  %v79_v61 = vsel %vm75_vm5, %v59_v54, %v62_v48  ;;  %v85_v62 = vsel %vm77_vm7, %v68_v50, %v84_v58  ;;  %v81_v0 = vsel %vm77_vm7, %v65_v49, %v80_v55 }
  0x91   :  { %v89_v63 = vsel %vm77_vm7, %v71_v52, %v88_v59  ;;  %v86_v1 = vsel %vm76_vm8, %v83_v56, %v85_v62  ;;  %vm208_vm9 = vcmp.gt.s32.totalorder %v207_v60, 0  ;;  %v492_v9 = vsel %vm76_vm8, %v79_v61, %v81_v0 }
  0x92   :  { %v90_v3 = vsel %vm76_vm8, %v87_v57, %v89_v63  ;;  %v116_v6 = vand.u32 65535, %v86_v1  ;;  %v117_v7 = vshrl.u32 %v86_v1, 16  ;;  %v209_v14 = vsel %vm208_vm9, %v207_v60, 0 }
  0x93   :  { %v94_v4 = vand.u32 65535, %v90_v3  ;;  %v95_v5 = vshrl.u32 %v90_v3, 16  ;;  %v211_v36 = vand.u32 31, %v209_v14  ;;  %v499_v47 = vshrl.u32 %v209_v14, 5 }
  0x94   :  { %v119_v17 = vmul.u32 %v117_v7, %v92_v27  ;;  %v120_v18 = vmul.u32 %v116_v6, %v93_v28  ;;  %v118_v24 = vmul.u32 %v116_v6, %v92_v27  ;;  %v121_v25 = vmul.u32 %v117_v7, %v93_v28 }
  0x95   :  { %v97_v10 = vmul.u32 %v95_v5, %v92_v27  ;;  %v98_v13 = vmul.u32 %v94_v4, %v93_v28  ;;  %v96_v15 = vmul.u32 %v94_v4, %v92_v27  ;;  %v99_v16 = vmul.u32 %v95_v5, %v93_v28 }
  0x96   :  { %v122_v30 = vshll.u32 %v119_v17, 16  ;;  %v123_v32 = vshrl.u32 %v119_v17, 16  ;;  %v124_v35 = vshll.u32 %v120_v18, 16  ;;  %v125_v39 = vshrl.u32 %v120_v18, 16 }
  0x97   :  { %v100_v19 = vshll.u32 %v97_v10, 16  ;;  %v101_v22 = vshrl.u32 %v97_v10, 16  ;;  %v102_v26 = vshll.u32 %v98_v13, 16  ;;  %v103_v29 = vshrl.u32 %v98_v13, 16 }
  0x98   :  { %vm126_vm11 = vc.u32 %v118_v24, %v122_v30  ;;  %v128_v41 = vadd.s32 %v122_v30, %v118_v24  ;;  %v496_v45 = vsub.s32 32, %v211_v36  ;;  %v214_v51 = vshll.u32 %v423_v31, %v211_v36 }
  0x99   :  { %vm104_vm10 = vc.u32 %v96_v15, %v100_v19  ;;  %v106_v34 = vadd.s32 %v100_v19, %v96_v15  ;;  %v127_v44 = vsel %vm126_vm11, 1, %v422_v2  ;;  %v217_v54 = vshll.u32 %v424_v33, %v211_v36 }
  0x9a   :  { %v105_v38 = vsel %vm104_vm10, 1, %v422_v2  ;;  %v129_v28 = vadd.s32 %v127_v44, %v121_v25  ;;  %vm130_vm13 = vc.u32 %v128_v41, %v124_v35  ;;  %v502_v50 = vadd.s32 %v128_v41, %v124_v35 }
  0x9b   :  { %v107_v42 = vadd.s32 %v105_v38, %v99_v16  ;;  %vm108_vm12 = vc.u32 %v106_v34, %v102_v26  ;;  %v131_v49 = vsel %vm130_vm13, 1, %v422_v2  ;;  %v215_v53 = vshrl.u32 %v424_v33, %v496_v45 }
  0x9c   :  { %v109_v27 = vsel %vm108_vm12, 1, %v422_v2  ;;  %v133_v52 = vadd.s32 %v131_v49, %v129_v28  ;;  %v218_v55 = vshrl.u32 %v425_v37, %v496_v45  ;;  %v220_v57 = vshll.u32 %v425_v37, %v211_v36 }
  0x9d   :  { %v111_v48 = vadd.s32 %v109_v27, %v107_v42  ;;  %v221_v58 = vshrl.u32 %v426_v40, %v496_v45  ;;  %v223_v59 = vshll.u32 %v426_v40, %v211_v36  ;;  %v514_v61 = vor.u32 %v215_v53, %v214_v51 }
  0x9e   :  { %v134_v60 = vadd.s32 %v133_v52, %v123_v32  ;;  %v516_v62 = vor.u32 %v218_v55, %v217_v54  ;;  %v224_v63 = vshrl.u32 %v427_v43, %v496_v45  ;;  %v226_v1 = vshll.u32 %v427_v43, %v211_v36 }
  0x9f   :  { %v112_v56 = vadd.s32 %v111_v48, %v101_v22  ;;  %v222_v0 = vor.u32 %v221_v58, %v220_v57  ;;  %v227_v37 = vshrl.u32 %v428_v46, %v496_v45  ;;  %vm229_vm15 = vcmp.lt.s32.totalorder %v499_v47, 1 }
  0xa0   :  { %v135_v3 = vadd.s32 %v134_v60, %v125_v39  ;;  %v225_v4 = vor.u32 %v224_v63, %v223_v59  ;;  %v528_v5 = vshll.u32 %v205_v8, 8  ;;  %v136_v6 = vmul.u32 %v470_v21, %v492_v9 }
  0xa1   :  { %v520_v33 = vadd.s32 %v112_v56, %v103_v29  ;;  %v228_v40 = vor.u32 %v227_v37, %v226_v1  ;;  %vm232_vm0 = vcmp.lt.s32.totalorder %v499_v47, 4  ;;  %v237_v43 = vsel %vm229_vm15, %v514_v61, %v516_v62 }
  0xa2   :  { %v139_v7 = vadd.s32 1, %v135_v3  ;;  %vm231_vm1 = vcmp.lt.s32.totalorder %v499_v47, 3  ;;  %v238_v46 = vsel %vm232_vm0, %v225_v4, 920167782  ;;  %v241_v8 = vsel %vm229_vm15, %v516_v62, %v222_v0 }
  0xa3   :  { %vm138_vm14 = vc.u32 %v520_v33, %v502_v50  ;;  %v242_v21 = vsel %vm232_vm0, %v228_v40, 1326507024  ;;  %vm230_vm2 = vcmp.lt.s32.totalorder %v499_v47, 2  ;;  %v239_v10 = vsel %vm231_vm1, %v222_v0, %v238_v46 }
  0xa4   :  { %v140_v9 = vsel %vm138_vm14, %v139_v7, %v135_v3  ;;  %v243_v13 = vsel %vm231_vm1, %v225_v4, %v242_v21  ;;  %v240_v15 = vsel %vm230_vm2, %v237_v43, %v239_v10  ;;  %v246_v17 = vand.u32 65535, %v528_v5 }
  0xa5   :  { %v141_v14 = vadd.s32 %v140_v9, %v136_v6  ;;  %v244_v16 = vsel %vm230_vm2, %v241_v8, %v243_v13  ;;  %v247_v18 = vshrl.u32 %v528_v5, 16  ;;  %v271_v24 = vshrl.u32 %v240_v15, 16 }
  0xa6   :  { %v248_v19 = vand.u32 65535, %v244_v16  ;;  %v249_v22 = vshrl.u32 %v244_v16, 16  ;;  %v270_v26 = vand.u32 65535, %v240_v15  ;;  %v234_v37 = vsel %vm232_vm0, %v222_v0, 2102212464 }
  0xa7   :  { %v142_v25 = vadd.s32 536870912, %v141_v14  ;;  %v273_v34 = vmul.u32 %v271_v24, %v246_v17  ;;  %v275_v55 = vmul.u32 %v271_v24, %v247_v18  ;;  %v213_v4 = vshrl.u32 %v423_v31, %v496_v45 }
  0xa8   :  { %v251_v29 = vmul.u32 %v249_v22, %v246_v17  ;;  %v252_v30 = vmul.u32 %v248_v19, %v247_v18  ;;  %v250_v35 = vmul.u32 %v248_v19, %v246_v17  ;;  %v253_v39 = vmul.u32 %v249_v22, %v247_v18 }
  0xa9   :  { %v556_v32 = vshrl.u32 %v142_v25, 30  ;;  %v272_v41 = vmul.u32 %v270_v26, %v246_v17  ;;  %v276_v42 = vshll.u32 %v273_v34, 16  ;;  %v274_v28 = vmul.u32 %v270_v26, %v247_v18 }
  0xaa   :  { %v254_v36 = vshll.u32 %v251_v29, 16  ;;  %v256_v44 = vshll.u32 %v252_v30, 16  ;;  %v255_v51 = vshrl.u32 %v251_v29, 16  ;;  %v257_v40 = vshrl.u32 %v252_v30, 16 }
  0xab   :  { %v144_v38 = vshll.u32 %v556_v32, 30  ;;  %vm280_vm5 = vc.u32 %v272_v41, %v276_v42  ;;  %v278_v57 = vshll.u32 %v274_v28, 16  ;;  %v282_v59 = vadd.s32 %v276_v42, %v272_v41 }
  0xac   :  { %vm258_vm3 = vc.u32 %v250_v35, %v254_v36  ;;  %v260_v27 = vadd.s32 %v254_v36, %v250_v35  ;;  %v281_v58 = vsel %vm280_vm5, 1, %v422_v2  ;;  %v277_v43 = vshrl.u32 %v273_v34, 16 }
  0xad   :  { %v145_v48 = vsub.s32 %v141_v14, %v144_v38  ;;  %v259_v49 = vsel %vm258_vm3, 1, %v422_v2  ;;  %v283_v63 = vadd.s32 %v281_v58, %v275_v55  ;;  %vm284_vm7 = vc.u32 %v282_v59, %v278_v57 }
  0xae   :  { %v261_v52 = vadd.s32 %v259_v49, %v253_v39  ;;  %vm262_vm4 = vc.u32 %v260_v27, %v256_v44  ;;  %v285_v6 = vsel %vm284_vm7, 1, %v422_v2  ;;  %v233_v8 = vsel %vm229_vm15, %v213_v4, %v514_v61 }
  0xaf   :  { %vm146_vm6 = vcmp.lt.s32.totalorder %v145_v48, 0  ;;  %v147_v53 = vsub.s32 0, %v145_v48  ;;  %v263_v54 = vsel %vm262_vm4, 1, %v422_v2  ;;  %v287_v46 = vadd.s32 %v285_v6, %v283_v63 }
  0xb0   :  { %v265_v56 = vadd.s32 %v263_v54, %v261_v52  ;;  %v235_v21 = vsel %vm231_vm1, %v516_v62, %v234_v37  ;;  %v279_v9 = vshrl.u32 %v274_v28, 16  ;;  %v137_v31 = vadd.s32 %v502_v50, %v520_v33 }
  0xb1   :  { %v148_v60 = vsel %vm146_vm6, %v147_v53, %v145_v48  ;;  %v288_v10 = vadd.s32 %v287_v46, %v277_v43  ;;  %v286_v2 = vadd.s32 %v282_v59, %v278_v57  ;;  %v236_v15 = vsel %vm230_vm2, %v233_v8, %v235_v21 }
  0xb2   :  { %v149_v1 = vclz %v148_v60  ;;  %v266_v3 = vadd.s32 %v265_v56, %v255_v51  ;;  %v290_v19 = vmul.u32 %v528_v5, %v236_v15  ;;  %vm45_vm10 = vcmp.lt.s32.totalorder %v462_v11, 0 }
  0xb3   :  { %v289_v16 = vadd.s32 %v288_v10, %v279_v9  ;;  %vm584_vm11 = vcmp.le.f32.partialorder %v43_v12, 0.7853982  ;;  %v167_v28 = vsub.s32 4, %v556_v32  ;;  %vm186_vm1 = vweird.f32 %v462_v11 }
  0xb4   :  { %v378_v7 = vadd.s32 4294967294, %v149_v1  ;;  %v267_v0 = vadd.s32 %v266_v3, %v257_v40  ;;  %vm199_vm2 = vcmp.lt.s32.totalorder %v468_v20, 0  ;;  %vm606_vm3 = vcmp.le.f32.partialorder %v197_v23, 0.7853982 }
  0xb5   :  { %v293_v62 = vadd.s32 1, %v289_v16  ;;  %v168_v54 = vsel %vm45_vm10, %v167_v28, %v556_v32  ;;  %vm340_vm7 = vweird.f32 %v468_v20 }
  0xb6   :  { %vm379_vm8 = vcmp.lt.s32.totalorder %v378_v7, 0  ;;  %vm292_vm9 = vc.u32 %v267_v0, %v286_v2  ;;  %v291_v59 = vadd.s32 %v286_v2, %v267_v0  ;;  %v170_v1 = vsel %vm584_vm11, 0, %v168_v54 }
  0xb7   :  { %v152_v45 = vsel %vm379_vm8, 0, %v378_v7  ;;  %v294_v25 = vsel %vm292_vm9, %v293_v62, %v289_v16  ;;  %v187_v8 = vand.u32 3, %v170_v1 }
  0xb8   :  { %v153_v13 = vsub.s32 32, %v152_v45  ;;  %v157_v14 = vsub.s32 4294967266, %v152_v45  ;;  %v154_v61 = vshll.u32 %v145_v48, %v152_v45  ;;  %v295_v26 = vadd.s32 %v294_v25, %v290_v19 }
  0xb9   :  { %vm189_vm14 = vcmp.eq.s32.totalorder %v187_v8, 0  ;;  %vm192_vm15 = vcmp.eq.s32.totalorder %v187_v8, 2  ;;  %vm188_vm0 = vcmp.lt.s32.totalorder %v187_v8, 2 }
  0xba   :  { %v155_v17 = vshrl.u32 %v137_v31, %v153_v13  ;;  %v158_v18 = vadd.s32 127, %v157_v14  ;;  %v296_v33 = vadd.s32 536870912, %v295_v26  ;;  %v395_v13 = vld [vmem:[%s623_s2] ss:$0 sm:$0xff]  ;;  %s429_s2 = smov [#allocation2]  }
  0xbb   :  { %s363_s18 = sshll.u32 %s429_s2, 4  ;;  %s364_s18 = int_to_ptr.vmem [resolvable:$true] %s363_s18 }
  0xbc   :  { %v156_v22 = vor.u32 %v155_v17, %v154_v61  ;;  %v159_v24 = vshll.u32 %v158_v18, 23  ;;  %v578_v34 = vshrl.u32 %v296_v33, 30 }
  0xbe   :  { %v160_v50 = vor.u32 4788187, %v159_v24  ;;  %v163_v30 = vcvt.s32.f32 %v156_v22  ;;  %v298_v35 = vshll.u32 %v578_v34, 30 }
  0xc0   :  { %v161_v29 = vand.u32 2147483647, %v160_v50  ;;  %v299_v38 = vsub.s32 %v295_v26, %v298_v35  ;;  %v321_v50 = vsub.s32 4, %v578_v34 }
  0xc2   :  { %v164_v47 = vmul.f32 %v163_v30, %v161_v29  ;;  %vm300_vm12 = vcmp.lt.s32.totalorder %v299_v38, 0  ;;  %v301_v42 = vsub.s32 0, %v299_v38  ;;  %v322_v23 = vsel %vm199_vm2, %v321_v50, %v578_v34 }
  0xc4   :  { %v165_v36 = vxor.u32 2147483648, %v164_v47  ;;  %v302_v27 = vsel %vm300_vm12, %v301_v42, %v299_v38 }
  0xc5   :  { %v303_v49 = vclz %v302_v27 }
  0xc6   :  { %v166_v39 = vsel %vm45_vm10, %v165_v36, %v164_v47 }
  0xc7   :  { %v169_v41 = vsel %vm584_vm11, %v462_v11, %v166_v39  ;;  %v381_v52 = vadd.s32 4294967294, %v303_v49 }
  0xc8   :  { %v171_v44 = vmul.f32 %v169_v41, %v169_v41 }
  0xc9   :  { %vm382_vm13 = vcmp.lt.s32.totalorder %v381_v52, 0 }
  0xca   :  { %v179_v48 = vmul.f32 -0.00019511016, %v171_v44  ;;  %v172_v51 = vmul.f32 -0.001358992, %v171_v44  ;;  %v306_v57 = vsel %vm382_vm13, 0, %v381_v52 }
  0xcb   :  { %v307_v60 = vsub.s32 32, %v306_v57  ;;  %v311_v63 = vsub.s32 4294967266, %v306_v57  ;;  %v308_v4 = vshll.u32 %v299_v38, %v306_v57  ;;  %v324_v38 = vsel %vm606_vm3, 0, %v322_v23 }
  0xcc   :  { %v180_v12 = vadd.f32 0.008332121, %v179_v48  ;;  %v173_v53 = vadd.f32 0.041655596, %v172_v51 }
  0xcd   :  { %v309_v40 = vshrl.u32 %v291_v59, %v307_v60  ;;  %v312_v6 = vadd.s32 127, %v311_v63 }
  0xce   :  { %v181_v55 = vmul.f32 %v180_v12, %v171_v44  ;;  %v174_v56 = vmul.f32 %v173_v53, %v171_v44 }
  0xcf   :  { %v310_v46 = vor.u32 %v309_v40, %v308_v4  ;;  %v313_v32 = vshll.u32 %v312_v6, 23 }
  0xd0   :  { %v182_v58 = vadd.f32 -0.16666654, %v181_v55  ;;  %v175_v37 = vadd.f32 -0.4999988, %v174_v56 }
  0xd1   :  { %v314_v10 = vor.u32 4788187, %v313_v32  ;;  %v317_v2 = vcvt.s32.f32 %v310_v46 }
  0xd2   :  { %v183_v3 = vmul.f32 %v182_v58, %v171_v44  ;;  %v176_v7 = vmul.f32 %v175_v37, %v171_v44  ;;  %v341_v44 = vand.u32 3, %v324_v38 }
  0xd3   :  { %v315_v45 = vand.u32 2147483647, %v314_v10 }
  0xd4   :  { %v184_v43 = vadd.f32 1.0, %v183_v3  ;;  %v177_v21 = vadd.f32 1.0, %v176_v7  ;;  %vm343_vm4 = vcmp.eq.s32.totalorder %v341_v44, 0  ;;  %vm346_vm5 = vcmp.eq.s32.totalorder %v341_v44, 2 }
  0xd5   :  { %v318_v14 = vmul.f32 %v317_v2, %v315_v45  ;;  %vm342_vm6 = vcmp.lt.s32.totalorder %v341_v44, 2 }
  0xd6   :  { %v185_v9 = vmul.f32 %v184_v43, %v169_v41  ;;  %v193_v31 = vxor.u32 2147483648, %v177_v21 }
  0xd7   :  { %v319_v17 = vxor.u32 2147483648, %v318_v14 }
  0xd8   :  { %v190_v0 = vxor.u32 2147483648, %v185_v9  ;;  %v194_v16 = vsel %vm192_vm15, %v193_v31, %v185_v9 }
  0xd9   :  { %v320_v22 = vsel %vm199_vm2, %v319_v17, %v318_v14 }
  0xda   :  { %v191_v15 = vsel %vm189_vm14, %v177_v21, %v190_v0  ;;  %v323_v24 = vsel %vm606_vm3, %v468_v20, %v320_v22 }
  0xdb   :  { %v195_v61 = vsel %vm188_vm0, %v191_v15, %v194_v16  ;;  %v325_v25 = vmul.f32 %v323_v24, %v323_v24 }
  0xdc   :  { %v196_v18 = vsel %vm186_vm1, nan, %v195_v61 }
  0xdd   :  { %v355_v62 = vmul.f32 %v395_v13, %v196_v18  ;;  %v333_v11 = vmul.f32 -0.00019511016, %v325_v25  ;;  %v326_v26 = vmul.f32 -0.001358992, %v325_v25 }
  0xdf   :  { %357 = vst [vmem:[#allocation2] sm:$0xff] %v355_v62  ;;  %v334_v33 = vadd.f32 0.008332121, %v333_v11  ;;  %v327_v29 = vadd.f32 0.041655596, %v326_v26 }
  0xe1   :  { %v335_v30 = vmul.f32 %v334_v33, %v325_v25  ;;  %v328_v47 = vmul.f32 %v327_v29, %v325_v25 }
  0xe3   :  { %v336_v35 = vadd.f32 -0.16666654, %v335_v30  ;;  %v329_v36 = vadd.f32 -0.4999988, %v328_v47 }
  0xe5   :  { %v337_v5 = vmul.f32 %v336_v35, %v325_v25  ;;  %v330_v39 = vmul.f32 %v329_v36, %v325_v25 }
  0xe7   :  { %v338_v41 = vadd.f32 1.0, %v337_v5  ;;  %v331_v42 = vadd.f32 1.0, %v330_v39 }
  0xe9   :  { %v339_v27 = vmul.f32 %v338_v41, %v323_v24  ;;  %v347_v28 = vxor.u32 2147483648, %v331_v42 }
  0xeb   :  { %v344_v48 = vxor.u32 2147483648, %v339_v27  ;;  %v348_v49 = vsel %vm346_vm5, %v347_v28, %v339_v27 }
  0xed   :  { %v345_v34 = vsel %vm343_vm4, %v331_v42, %v344_v48 }
  0xee   :  { %v349_v51 = vsel %vm342_vm6, %v345_v34, %v348_v49 }
  0xef   :  { %v350_v12 = vsel %vm340_vm7, nan, %v349_v51 }
  0xf0   :  { %v356_v52 = vmul.f32 %v395_v13, %v350_v12 }
  0xf2   :  { %358 = vst [vmem:[#allocation2 + $0x8] sm:$0xff] %v356_v52 }
  0xf3   :  { %371 = dma.vmem_to_hbm [thread:$0]  %s364_s18, 256, %s366_s21, [#allocation3], %s430_s22, %s430_s22, %s431_s23  }
  0xf4   :  { %420 = dma.done.wait [#allocation3], 256  }
  0xf5   :  { %421 = vsyncadd [#allocation3], 4294967040 }
  0xf6   :  { %376 = vsyncpa [#allocation3], 1 }

</bundles_post_ra>
